<compile_context>
chip_gen: v7x
topology: tpu7x:2x2x1
jax: 0.10.0
libtpu: 0.0.40
codegen_flags: <defaults>
</compile_context>

<pallas_src>
import functools

import jax
import jax.numpy as jnp
from jax.experimental import pallas as pl
from jax.experimental.pallas import tpu as pltpu

LN_EPS = 1e-5  # torch.nn.LayerNorm default


def _pht_kernel(x_ref, w_ref, b_ref, g_ref, beta_ref, o_ref):
    # x_ref:    (tile_rows, H) -- native dtype (f32 or bf16), no upcast here
    # w_ref:    (H, H) in PyTorch Linear layout (out, in); resident in VMEM
    # b_ref:    (1, H)  dense bias
    # g_ref:    (1, H)  LayerNorm weight
    # beta_ref: (1, H)  LayerNorm bias
    # dense: y = x @ W^T  (contract rhs dim 1), f32 accumulation on the MXU
    h = jax.lax.dot_general(
        x_ref[...], w_ref[...],
        dimension_numbers=(((1,), (1,)), ((), ())),
        preferred_element_type=jnp.float32,
    )
    h = h + b_ref[...].astype(jnp.float32)

    # activation: tanh (EUP)
    h = jnp.tanh(h)

    # LayerNorm over last dim, elementwise affine (f32 math)
    mean = jnp.mean(h, axis=-1, keepdims=True)
    centered = h - mean
    var = jnp.mean(centered * centered, axis=-1, keepdims=True)
    h = centered * jax.lax.rsqrt(var + LN_EPS)
    h = h * g_ref[...].astype(jnp.float32) + beta_ref[...].astype(jnp.float32)

    o_ref[...] = h.astype(o_ref.dtype)


@functools.partial(jax.jit, static_argnames=("tile_rows", "use_bf16_matmul"))
def prediction_head_transform(hidden_states, w, b, ln_w, ln_b, *,
                              tile_rows=256, use_bf16_matmul=False):
    """hidden_states: [B, S, H]; w: [H, H] (PyTorch Linear layout (out, in));
    b, ln_w, ln_b: [H].

    tile_rows: rows per grid step (multiple of 8; 256-1024 recommended for
    real shapes -- sweep per chip generation / VMEM budget).
    use_bf16_matmul: cast x and W to bf16 for MXU-native matmul (f32 accum).
    """
    B, S, H = hidden_states.shape
    rows = B * S
    assert tile_rows % 8 == 0

    x2d = hidden_states.reshape(rows, H)

    if use_bf16_matmul:
        # TODO(synk): in production, store W/x as bf16 once at init instead of
        # casting per call.
        x2d = x2d.astype(jnp.bfloat16)
        w = w.astype(jnp.bfloat16)

    # Pad rows to a multiple of tile_rows. Padded rows are computed and then
    # discarded; all math is row-wise independent so real rows are unaffected.
    num_tiles = pl.cdiv(rows, tile_rows)
    rows_padded = num_tiles * tile_rows
    if rows_padded != rows:
        x2d = jnp.pad(x2d, ((0, rows_padded - rows), (0, 0)))

    b2d = b.reshape(1, H)
    g2d = ln_w.reshape(1, H)
    beta2d = ln_b.reshape(1, H)

    # VMEM budget: double-buffered in/out row tiles + resident weight
    # (conservatively counted twice) + f32 intermediates headroom.
    x_item = jnp.dtype(x2d.dtype).itemsize
    w_item = jnp.dtype(w.dtype).itemsize
    est = (4 * tile_rows * H * x_item      # x tile + out tile, double-buffered
           + 2 * H * H * w_item            # resident weight
           + 2 * tile_rows * H * 4         # f32 intermediates
           + 8 * H * 4)                    # bias / gamma / beta
    vmem_limit = int(min(max(2 * est, 32 * 1024 * 1024), 64 * 1024 * 1024))

    out = pl.pallas_call(
        _pht_kernel,
        out_shape=jax.ShapeDtypeStruct((rows_padded, H), hidden_states.dtype),
        grid_spec=pltpu.PrefetchScalarGridSpec(
            num_scalar_prefetch=0,
            grid=(num_tiles,),
            in_specs=[
                pl.BlockSpec((tile_rows, H), lambda i: (i, 0)),  # x row tile
                pl.BlockSpec((H, H), lambda i: (0, 0)),          # W (resident)
                pl.BlockSpec((1, H), lambda i: (0, 0)),          # dense bias
                pl.BlockSpec((1, H), lambda i: (0, 0)),          # LN gamma
                pl.BlockSpec((1, H), lambda i: (0, 0)),          # LN beta
            ],
            out_specs=pl.BlockSpec((tile_rows, H), lambda i: (i, 0)),
        ),
        compiler_params=pltpu.CompilerParams(
            dimension_semantics=("parallel",),
            vmem_limit_bytes=vmem_limit,
        ),
    )(x2d, w, b2d, g2d, beta2d)

    if rows_padded != rows:
        out = out[:rows]
    return out.reshape(B, S, H)


def _reference(hidden_states, w, b, ln_w, ln_b):
    h = jnp.einsum("bsh,oh->bso", hidden_states.astype(jnp.float32),
                   w.astype(jnp.float32)) + b
    h = jnp.tanh(h)
    mean = jnp.mean(h, axis=-1, keepdims=True)
    var = jnp.mean((h - mean) ** 2, axis=-1, keepdims=True)
    h = (h - mean) * jax.lax.rsqrt(var + LN_EPS)
    return h * ln_w + ln_b


if __name__ == "__main__":
    key = jax.random.PRNGKey(0)
    B, S, H = 2, 8, 32  # batch, input_length (seq), hidden_size
    # NOTE: real hidden sizes (768/1024) give lane-dense stores; H=32 here is
    # just the small demo shape implied by the module config.

    k_x, k_w, k_b = jax.random.split(key, 3)
    x = jax.random.normal(k_x, (B, S, H), dtype=jnp.float32)

    # nn.Linear(hidden, hidden): weight (out, in), bias (out,)
    bound = 1.0 / (H ** 0.5)
    w = jax.random.uniform(k_w, (H, H), jnp.float32, -bound, bound)
    b = jax.random.uniform(k_b, (H,), jnp.float32, -bound, bound)

    # nn.LayerNorm(hidden, elementwise_affine=True): weight ones, bias zeros
    ln_w = jnp.ones((H,), jnp.float32)
    ln_b = jnp.zeros((H,), jnp.float32)

    out = prediction_head_transform(x, w, b, ln_w, ln_b)
    out = jax.block_until_ready(out)

    ref = _reference(x, w, b, ln_w, ln_b)
    assert out.shape == (B, S, H)
    assert jnp.allclose(out, ref, atol=1e-5, rtol=1e-5), float(
        jnp.max(jnp.abs(out - ref)))

    print("KERNEL_OK")
</pallas_src>

<mosaic_0001>
module attributes {stable_mosaic.version = 11 : i64} {
  func.func @_pht_kernel(%arg0: i32, %arg1: memref<256x32xf32, #tpu.memory_space<vmem>>, %arg2: memref<32x32xf32, #tpu.memory_space<vmem>>, %arg3: memref<1x32xf32, #tpu.memory_space<vmem>>, %arg4: memref<1x32xf32, #tpu.memory_space<vmem>>, %arg5: memref<1x32xf32, #tpu.memory_space<vmem>>, %arg6: memref<256x32xf32, #tpu.memory_space<vmem>>) attributes {dimension_semantics = [#tpu.dimension_semantics<parallel>], iteration_bounds = array<i64: 1>, scalar_prefetch = 0 : i64, scratch_operands = 0 : i64, tpu.core_type = #tpu.core_type<tc>, window_params = [{transform_indices = @transform_0, window_bounds = array<i64: 256, 32>}, {pipeline_mode = #tpu.pipeline_mode<synchronous>, transform_indices = @transform_1, window_bounds = array<i64: 32, 32>}, {pipeline_mode = #tpu.pipeline_mode<synchronous>, transform_indices = @transform_2, window_bounds = array<i64: 1, 32>}, {pipeline_mode = #tpu.pipeline_mode<synchronous>, transform_indices = @transform_3, window_bounds = array<i64: 1, 32>}, {pipeline_mode = #tpu.pipeline_mode<synchronous>, transform_indices = @transform_4, window_bounds = array<i64: 1, 32>}, {transform_indices = @transform_5, window_bounds = array<i64: 256, 32>}]} {
    %c0 = arith.constant 0 : index
    %c0_0 = arith.constant 0 : index
    %0 = vector.load %arg1[%c0, %c0_0] : memref<256x32xf32, #tpu.memory_space<vmem>>, vector<256x32xf32>
    %c0_1 = arith.constant 0 : index
    %c0_2 = arith.constant 0 : index
    %1 = vector.load %arg2[%c0_1, %c0_2] : memref<32x32xf32, #tpu.memory_space<vmem>>, vector<32x32xf32>
    %cst = arith.constant dense<0.000000e+00> : vector<256x32xf32>
    %2 = tpu.matmul %0, %1, %cst {dimension_numbers = #tpu.dot_dimension_numbers<[1], [1], [0], [0], [0, 0, 1, 0], [], []>} : vector<256x32xf32>, vector<32x32xf32>, vector<256x32xf32> -> vector<256x32xf32>
    %c0_3 = arith.constant 0 : index
    %c0_4 = arith.constant 0 : index
    %3 = vector.load %arg3[%c0_3, %c0_4] : memref<1x32xf32, #tpu.memory_space<vmem>>, vector<1x32xf32>
    %4 = vector.broadcast %3 : vector<1x32xf32> to vector<256x32xf32>
    %5 = arith.addf %2, %4 : vector<256x32xf32>
    %6 = math.tanh %5 : vector<256x32xf32>
    %cst_5 = arith.constant dense<0.000000e+00> : vector<256xf32>
    %7 = vector.multi_reduction <add>, %6, %cst_5 [1] : vector<256x32xf32> to vector<256xf32>
    %8 = vector.shape_cast %7 : vector<256xf32> to vector<256x1xf32>
    %cst_6 = arith.constant 3.200000e+01 : f32
    %9 = vector.broadcast %cst_6 : f32 to vector<256x1xf32>
    %10 = arith.divf %8, %9 : vector<256x1xf32>
    %11 = vector.broadcast %10 : vector<256x1xf32> to vector<256x32xf32>
    %12 = arith.subf %6, %11 : vector<256x32xf32>
    %13 = arith.mulf %12, %12 : vector<256x32xf32>
    %cst_7 = arith.constant dense<0.000000e+00> : vector<256xf32>
    %14 = vector.multi_reduction <add>, %13, %cst_7 [1] : vector<256x32xf32> to vector<256xf32>
    %15 = vector.shape_cast %14 : vector<256xf32> to vector<256x1xf32>
    %cst_8 = arith.constant 3.200000e+01 : f32
    %16 = vector.broadcast %cst_8 : f32 to vector<256x1xf32>
    %17 = arith.divf %15, %16 : vector<256x1xf32>
    %cst_9 = arith.constant 9.99999974E-6 : f32
    %18 = vector.broadcast %cst_9 : f32 to vector<256x1xf32>
    %19 = arith.addf %17, %18 : vector<256x1xf32>
    %20 = math.rsqrt %19 : vector<256x1xf32>
    %21 = vector.broadcast %20 : vector<256x1xf32> to vector<256x32xf32>
    %22 = arith.mulf %12, %21 : vector<256x32xf32>
    %c0_10 = arith.constant 0 : index
    %c0_11 = arith.constant 0 : index
    %23 = vector.load %arg4[%c0_10, %c0_11] : memref<1x32xf32, #tpu.memory_space<vmem>>, vector<1x32xf32>
    %24 = vector.broadcast %23 : vector<1x32xf32> to vector<256x32xf32>
    %25 = arith.mulf %22, %24 : vector<256x32xf32>
    %c0_12 = arith.constant 0 : index
    %c0_13 = arith.constant 0 : index
    %26 = vector.load %arg5[%c0_12, %c0_13] : memref<1x32xf32, #tpu.memory_space<vmem>>, vector<1x32xf32>
    %27 = vector.broadcast %26 : vector<1x32xf32> to vector<256x32xf32>
    %28 = arith.addf %25, %27 : vector<256x32xf32>
    %c0_14 = arith.constant 0 : index
    %c0_15 = arith.constant 0 : index
    %29 = vector.load %arg6[%c0_14, %c0_15] : memref<256x32xf32, #tpu.memory_space<vmem>>, vector<256x32xf32>
    tpu.vector_store %arg6[%c0_14, %c0_15], %28 {strides = array<i32>} : memref<256x32xf32, #tpu.memory_space<vmem>>, vector<256x32xf32>,
    return
  }
  func.func @transform_0(%arg0: i32) -> (i32, i32) {
    %c0_i32 = arith.constant 0 : i32
    %c0_i32_0 = arith.constant 0 : i32
    return %arg0, %c0_i32 : i32, i32
  }
  func.func @transform_1(%arg0: i32) -> (i32, i32) {
    %c0_i32 = arith.constant 0 : i32
    %c0_i32_0 = arith.constant 0 : i32
    %c0_i32_1 = arith.constant 0 : i32
    return %c0_i32, %c0_i32_0 : i32, i32
  }
  func.func @transform_2(%arg0: i32) -> (i32, i32) {
    %c0_i32 = arith.constant 0 : i32
    %c0_i32_0 = arith.constant 0 : i32
    %c0_i32_1 = arith.constant 0 : i32
    return %c0_i32, %c0_i32_0 : i32, i32
  }
  func.func @transform_3(%arg0: i32) -> (i32, i32) {
    %c0_i32 = arith.constant 0 : i32
    %c0_i32_0 = arith.constant 0 : i32
    %c0_i32_1 = arith.constant 0 : i32
    return %c0_i32, %c0_i32_0 : i32, i32
  }
  func.func @transform_4(%arg0: i32) -> (i32, i32) {
    %c0_i32 = arith.constant 0 : i32
    %c0_i32_0 = arith.constant 0 : i32
    %c0_i32_1 = arith.constant 0 : i32
    return %c0_i32, %c0_i32_0 : i32, i32
  }
  func.func @transform_5(%arg0: i32) -> (i32, i32) {
    %c0_i32 = arith.constant 0 : i32
    %c0_i32_0 = arith.constant 0 : i32
    return %arg0, %c0_i32 : i32, i32
  }
}

</mosaic_0001>

<bundles_post_ra>
// kernel: prediction_head_transform.1
= control target key start
LH: loop header
LB: loop body
LE: loop exit
PB: predicated region body
PF: predicated region fallthrough
CT: control target
= control target key end

     0   :  { %vm63_vm0 = vcmask 261120   ;;  %s2027_s1 = inlined_call_operand.vmem [shape: f32[32,32], index: 1, kind: input, shape index: {}]   ;;  %s2028_s0 = inlined_call_operand.vmem [shape: f32[256,32], index: 0, kind: input, shape index: {}]   ;;  %s2029_s2 = inlined_call_operand.vmem [shape: f32[1,32], index: 2, kind: input, shape index: {}]   ;;  %s2030_s3 = inlined_call_operand.vmem [shape: f32[1,32], index: 3, kind: input, shape index: {}]   ;;  %s2031_s4 = inlined_call_operand.vmem [shape: f32[1,32], index: 4, kind: input, shape index: {}]   ;;  %s2032_s5 = inlined_call_operand.vmem [shape: f32[256,32], index: 5, kind: output, shape index: {}]  }
   0x1   :  { %v52_v0 = vld [vmem:[%s2027_s1] sm:$0xff]  ;;  %v53_v1 = vld [vmem:[%s2027_s1 + $0x8] sm:$0xff]  ;;  %vm1273_vm1 = vmpackc.low %vm63_vm0, %vm63_vm0 }
   0x2   :  { %v1091_v3 = vpack.c.bf16 %v53_v1, %v52_v0  ;;  %v54_v4 = vld [vmem:[%s2027_s1 + $0x10] sm:$0xff]  ;;  %v55_v5 = vld [vmem:[%s2027_s1 + $0x18] sm:$0xff]  ;;  %v20_v6 = vld [vmem:[%s2028_s0] sm:$0xff] }
   0x3   :  { %v1097_v7 = vpack.c.bf16 %v55_v5, %v54_v4  ;;  %1043 = vmatprep.mubr.msk.f32.mxu0 %vm63_vm0, %v20_v6  ;;  %v36_v8 = vld [vmem:[%s2028_s0 + $0x80] sm:$0xff]  ;;  %v21_v9 = vld [vmem:[%s2028_s0 + $0x8] sm:$0xff]  ;;  %v22_v11 = vld [vmem:[%s2028_s0 + $0x10] sm:$0xff] }
   0x4   :  { %1093 = vmatprep.subr.msk.bf16.mxu0 %vm1273_vm1, %v1091_v3  ;;  %1103 = vmatprep.subr.msk.bf16.mxu1 %vm1273_vm1, %v1091_v3  ;;  %v37_v10 = vld [vmem:[%s2028_s0 + $0x88] sm:$0xff]  ;;  %v38_v12 = vld [vmem:[%s2028_s0 + $0x90] sm:$0xff]  ;;  %v23_v13 = vld [vmem:[%s2028_s0 + $0x18] sm:$0xff] }
   0x5   :  { %1096 = vmatpush3.bf16.xpose.msk.msra.mxu0 %vm1273_vm1, %v1091_v3  ;;  %1105 = vmatpush3.bf16.xpose.msk.msra.mxu1 %vm1273_vm1, %v1091_v3  ;;  %v39_v14 = vld [vmem:[%s2028_s0 + $0x98] sm:$0xff]  ;;  %v24_v15 = vld [vmem:[%s2028_s0 + $0x20] sm:$0xff]  ;;  %v25_v17 = vld [vmem:[%s2028_s0 + $0x28] sm:$0xff] }
   0x6   :  { %1099 = vmatprep.subr.msk.bf16.mxu0 %vm1273_vm1, %v1097_v7  ;;  %1104 = vmatprep.subr.msk.bf16.mxu1 %vm1273_vm1, %v1097_v7  ;;  %v40_v16 = vld [vmem:[%s2028_s0 + $0xa0] sm:$0xff]  ;;  %v41_v18 = vld [vmem:[%s2028_s0 + $0xa8] sm:$0xff]  ;;  %v26_v19 = vld [vmem:[%s2028_s0 + $0x30] sm:$0xff] }
   0x7   :  { %1067 = vmatprep.mubr.msk.f32.mxu1 %vm63_vm0, %v36_v8  ;;  %v42_v20 = vld [vmem:[%s2028_s0 + $0xb0] sm:$0xff]  ;;  %v27_v21 = vld [vmem:[%s2028_s0 + $0x38] sm:$0xff]  ;;  %v28_v23 = vld [vmem:[%s2028_s0 + $0x40] sm:$0xff] }
   0x8   :  { %v43_v22 = vld [vmem:[%s2028_s0 + $0xb8] sm:$0xff]  ;;  %v44_v24 = vld [vmem:[%s2028_s0 + $0xc0] sm:$0xff]  ;;  %v29_v25 = vld [vmem:[%s2028_s0 + $0x48] sm:$0xff] }
   0x9   :  { %v45_v26 = vld [vmem:[%s2028_s0 + $0xc8] sm:$0xff]  ;;  %v30_v27 = vld [vmem:[%s2028_s0 + $0x50] sm:$0xff]  ;;  %v31_v29 = vld [vmem:[%s2028_s0 + $0x58] sm:$0xff] }
   0xa   :  { %v46_v28 = vld [vmem:[%s2028_s0 + $0xd0] sm:$0xff]  ;;  %v47_v30 = vld [vmem:[%s2028_s0 + $0xd8] sm:$0xff]  ;;  %v32_v31 = vld [vmem:[%s2028_s0 + $0x60] sm:$0xff] }
   0xb   :  { %v48_v32 = vld [vmem:[%s2028_s0 + $0xe0] sm:$0xff]  ;;  %v33_v33 = vld [vmem:[%s2028_s0 + $0x68] sm:$0xff]  ;;  %v34_v35 = vld [vmem:[%s2028_s0 + $0x70] sm:$0xff] }
   0xc   :  { %v49_v34 = vld [vmem:[%s2028_s0 + $0xe8] sm:$0xff]  ;;  %v50_v36 = vld [vmem:[%s2028_s0 + $0xf0] sm:$0xff]  ;;  %v35_v37 = vld [vmem:[%s2028_s0 + $0x78] sm:$0xff] }
   0xd   :  { %1102 = vmatpush3.bf16.xpose.msk.msra.mxu0 %vm1273_vm1, %v1097_v7  ;;  %1106 = vmatpush3.bf16.xpose.msk.msra.mxu1 %vm1273_vm1, %v1097_v7  ;;  %v51_v38 = vld [vmem:[%s2028_s0 + $0xf8] sm:$0xff]  ;;  %v1430_v39 = vld [vmem:[%s2029_s2] ss:$0 sm:$0xff] }
  0x14   :  { %1044 = vmatmul.mubr.msk.f32.vlgmr.msra.gmra.mrb[0].mxu0 %vm63_vm0, %v21_v9  ;;  %1068 = vmatmul.mubr.msk.f32.vlgmr.msra.gmra.mrb[0].mxu1 %vm63_vm0, %v37_v10 }
  0x15   :  { %1046 = vmatprep.mubr.msk.f32.mxu0 %vm63_vm0, %v22_v11  ;;  %1070 = vmatprep.mubr.msk.f32.mxu1 %vm63_vm0, %v38_v12 }
  0x18   :  { %1047 = vmatmul.mubr.msk.f32.gmra.mrb[2].mxu0 %vm63_vm0, %v23_v13  ;;  %1071 = vmatmul.mubr.msk.f32.gmra.mrb[2].mxu1 %vm63_vm0, %v39_v14 }
  0x19   :  { %1049 = vmatprep.mubr.msk.f32.mxu0 %vm63_vm0, %v24_v15  ;;  %1073 = vmatprep.mubr.msk.f32.mxu1 %vm63_vm0, %v40_v16 }
  0x1c   :  { %1050 = vmatmul.mubr.msk.f32.gmra.mrb[4].mxu0 %vm63_vm0, %v25_v17  ;;  %1074 = vmatmul.mubr.msk.f32.gmra.mrb[4].mxu1 %vm63_vm0, %v41_v18 }
  0x1d   :  { %1052 = vmatprep.mubr.msk.f32.mxu0 %vm63_vm0, %v26_v19  ;;  %1076 = vmatprep.mubr.msk.f32.mxu1 %vm63_vm0, %v42_v20 }
  0x20   :  { %1053 = vmatmul.mubr.msk.f32.gmra.mrb[6].mxu0 %vm63_vm0, %v27_v21  ;;  %1077 = vmatmul.mubr.msk.f32.gmra.mrb[6].mxu1 %vm63_vm0, %v43_v22 }
  0x21   :  { %1055 = vmatprep.mubr.msk.f32.mxu0 %vm63_vm0, %v28_v23  ;;  %1079 = vmatprep.mubr.msk.f32.mxu1 %vm63_vm0, %v44_v24 }
  0x24   :  { %1056 = vmatmul.mubr.msk.f32.gmra.mrb[8].mxu0 %vm63_vm0, %v29_v25  ;;  %1080 = vmatmul.mubr.msk.f32.gmra.mrb[8].mxu1 %vm63_vm0, %v45_v26 }
  0x25   :  { %1058 = vmatprep.mubr.msk.f32.mxu0 %vm63_vm0, %v30_v27  ;;  %1082 = vmatprep.mubr.msk.f32.mxu1 %vm63_vm0, %v46_v28 }
  0x28   :  { %1059 = vmatmul.mubr.msk.f32.gmra.mrb[10].mxu0 %vm63_vm0, %v31_v29  ;;  %1083 = vmatmul.mubr.msk.f32.gmra.mrb[10].mxu1 %vm63_vm0, %v47_v30 }
  0x29   :  { %1061 = vmatprep.mubr.msk.f32.mxu0 %vm63_vm0, %v32_v31  ;;  %1085 = vmatprep.mubr.msk.f32.mxu1 %vm63_vm0, %v48_v32 }
  0x2c   :  { %1062 = vmatmul.mubr.msk.f32.gmra.mrb[12].mxu0 %vm63_vm0, %v33_v33  ;;  %1086 = vmatmul.mubr.msk.f32.gmra.mrb[12].mxu1 %vm63_vm0, %v49_v34 }
  0x2d   :  { %1064 = vmatprep.mubr.msk.f32.mxu0 %vm63_vm0, %v34_v35  ;;  %1088 = vmatprep.mubr.msk.f32.mxu1 %vm63_vm0, %v50_v36 }
  0x30   :  { %1065 = vmatmul.mubr.msk.f32.gmra.mrb[14].mxu0 %vm63_vm0, %v35_v37  ;;  %1089 = vmatmul.mubr.msk.f32.gmra.mrb[14].mxu1 %vm63_vm0, %v51_v38 }
  0xe7   :  { %v1045_v40 = vpop.f32.mrb[0].mxu0  ;;  %v1069_v41 = vpop.f32.mrb[0].mxu1 }
  0xe8   :  { %v244_v42 = vadd.f32 %v1045_v40, %v1430_v39  ;;  %v324_v43 = vadd.f32 %v1069_v41, %v1430_v39  ;;  %v238_v44 = vpop.f32.mrb[1].mxu0  ;;  %v318_v45 = vpop.f32.mrb[1].mxu1 }
  0xe9   :  { %v239_v46 = vadd.f32 %v1430_v39, %v238_v44  ;;  %v319_v47 = vadd.f32 %v1430_v39, %v318_v45 }
  0xea   :  { %1107 = vtanh.f32 %v244_v42 }
  0xeb   :  { %1109 = vtanh.f32 %v324_v43  ;;  %v1048_v48 = vpop.f32.mrb[2].mxu0  ;;  %v1072_v49 = vpop.f32.mrb[2].mxu1 }
  0xec   :  { %1111 = vtanh.f32 %v239_v46  ;;  %v254_v50 = vadd.f32 %v1048_v48, %v1430_v39  ;;  %v248_v51 = vpop.f32.mrb[3].mxu0  ;;  %v334_v52 = vadd.f32 %v1072_v49, %v1430_v39  ;;  %v328_v53 = vpop.f32.mrb[3].mxu1 }
  0xed   :  { %v329_v56 = vadd.f32 %v1430_v39, %v328_v53  ;;  %v249_v59 = vadd.f32 %v1430_v39, %v248_v51 }
  0xee   :  { %1113 = vtanh.f32 %v254_v50 }
  0xef   :  { %1115 = vtanh.f32 %v319_v47  ;;  %v1051_v54 = vpop.f32.mrb[4].mxu0  ;;  %v1075_v55 = vpop.f32.mrb[4].mxu1 }
  0xf0   :  { %1117 = vtanh.f32 %v334_v52  ;;  %v258_v57 = vpop.f32.mrb[5].mxu0  ;;  %v338_v58 = vpop.f32.mrb[5].mxu1  ;;  %v264_v61 = vadd.f32 %v1051_v54, %v1430_v39  ;;  %v344_v8 = vadd.f32 %v1075_v55, %v1430_v39 }
  0xf1   :  { %v259_v60 = vadd.f32 %v1430_v39, %v258_v57  ;;  %1119 = vtanh.f32 %v329_v56  ;;  %v339_v7 = vadd.f32 %v1430_v39, %v338_v58 }
  0xf2   :  { %1121 = vtanh.f32 %v249_v59 }
  0xf3   :  { %v1054_v62 = vpop.f32.mrb[6].mxu0  ;;  %v1078_v63 = vpop.f32.mrb[6].mxu1  ;;  %1123 = vtanh.f32 %v259_v60 }
  0xf4   :  { %v1442_v0 = vpop.eup %1107  ;;  %v268_v1 = vpop.f32.mrb[7].mxu0  ;;  %1125 = vtanh.f32 %v264_v61  ;;  %v274_v19 = vadd.f32 %v1054_v62, %v1430_v39  ;;  %v354_v29 = vadd.f32 %v1078_v63, %v1430_v39 }
  0xf5   :  { %v348_v2 = vpop.f32.mrb[7].mxu1  ;;  %v1444_v3 = vpop.eup %1109  ;;  %v432_v4 = vsel %vm63_vm0, %v1442_v0, 0.0  ;;  %1127 = vtanh.f32 %v339_v7  ;;  %v269_v18 = vadd.f32 %v1430_v39, %v268_v1 }
  0xf6   :  { %v1448_v5 = vpop.eup %1111  ;;  %v480_v6 = vsel %vm63_vm0, %v1444_v3, 0.0  ;;  %433 = vadd.xlane.f32.xlu0 %v432_v4  ;;  %1129 = vtanh.f32 %v344_v8  ;;  %v349_v27 = vadd.f32 %v1430_v39, %v348_v2 }
  0xf7   :  { %481 = vadd.xlane.f32.xlu1 %v480_v6  ;;  %v1057_v9 = vpop.f32.mrb[8].mxu0  ;;  %v1081_v10 = vpop.f32.mrb[8].mxu1  ;;  %v429_v16 = vsel %vm63_vm0, %v1448_v5, 0.0  ;;  %1131 = vtanh.f32 %v269_v18 }
  0xf8   :  { %v1454_v11 = vpop.eup %1113  ;;  %v278_v12 = vpop.f32.mrb[9].mxu0  ;;  %1133 = vtanh.f32 %v274_v19  ;;  %v284_v40 = vadd.f32 %v1057_v9, %v1430_v39  ;;  %v364_v50 = vadd.f32 %v1081_v10, %v1430_v39 }
  0xf9   :  { %v358_v13 = vpop.f32.mrb[9].mxu1  ;;  %v1456_v14 = vpop.eup %1115  ;;  %v438_v15 = vsel %vm63_vm0, %v1454_v11, 0.0  ;;  %1135 = vtanh.f32 %v349_v27  ;;  %v279_v38 = vadd.f32 %v1430_v39, %v278_v12 }
  0xfa   :  { %v1462_v17 = vpop.eup %1117  ;;  %430 = vadd.xlane.f32.xlu0 %v429_v16  ;;  %v477_v25 = vsel %vm63_vm0, %v1456_v14, 0.0  ;;  %1137 = vtanh.f32 %v354_v29  ;;  %v359_v49 = vadd.f32 %v1430_v39, %v358_v13 }
  0xfb   :  { %439 = vadd.xlane.f32.xlu1 %v438_v15  ;;  %v1060_v20 = vpop.f32.mrb[10].mxu0  ;;  %v1084_v21 = vpop.f32.mrb[10].mxu1  ;;  %v486_v22 = vsel %vm63_vm0, %v1462_v17, 0.0  ;;  %1139 = vtanh.f32 %v279_v38 }
  0xfc   :  { %v288_v23 = vpop.f32.mrb[11].mxu0  ;;  %v368_v24 = vpop.f32.mrb[11].mxu1  ;;  %1141 = vtanh.f32 %v284_v40  ;;  %v294_v56 = vadd.f32 %v1060_v20, %v1430_v39  ;;  %v374_v62 = vadd.f32 %v1084_v21, %v1430_v39 }
  0xfd   :  { %v1470_v26 = vpop.eup %1119  ;;  %1143 = vtanh.f32 %v359_v49  ;;  %v289_v55 = vadd.f32 %v1430_v39, %v288_v23  ;;  %v369_v61 = vadd.f32 %v1430_v39, %v368_v24 }
  0xfe   :  { %478 = vadd.xlane.f32.xlu0 %v477_v25  ;;  %v1473_v28 = vpop.eup %1121  ;;  %v483_v36 = vsel %vm63_vm0, %v1470_v26, 0.0  ;;  %1145 = vtanh.f32 %v364_v50 }
  0xff   :  { %487 = vadd.xlane.f32.xlu1 %v486_v22  ;;  %v1063_v30 = vpop.f32.mrb[12].mxu0  ;;  %v1476_v31 = vpop.f32.mrb[12].mxu1  ;;  %v435_v37 = vsel %vm63_vm0, %v1473_v28, 0.0  ;;  %1147 = vtanh.f32 %v289_v55 }
 0x100   :  { %v1478_v32 = vpop.eup %1123  ;;  %v298_v33 = vpop.f32.mrb[13].mxu0  ;;  %1149 = vtanh.f32 %v294_v56  ;;  %v304_v7 = vadd.f32 %v1063_v30, %v1430_v39  ;;  %v384_v15 = vadd.f32 %v1476_v31, %v1430_v39 }
 0x101   :  { %v378_v34 = vpop.f32.mrb[13].mxu1  ;;  %v1480_v35 = vpop.eup %1125  ;;  %v441_v41 = vsel %vm63_vm0, %v1478_v32, 0.0  ;;  %1151 = vtanh.f32 %v369_v61  ;;  %v299_v6 = vadd.f32 %v1430_v39, %v298_v33 }
 0x102   :  { %484 = vadd.xlane.f32.xlu0 %v483_v36  ;;  %v1492_v44 = vpop.eup %1127  ;;  %v444_v45 = vsel %vm63_vm0, %v1480_v35, 0.0  ;;  %1153 = vtanh.f32 %v374_v62  ;;  %v379_v13 = vadd.f32 %v1430_v39, %v378_v34 }
 0x103   :  { %436 = vadd.xlane.f32.xlu1 %v435_v37  ;;  %v1066_v42 = vpop.f32.mrb[14].mxu0  ;;  %v1490_v43 = vpop.f32.mrb[14].mxu1  ;;  %v489_v51 = vsel %vm63_vm0, %v1492_v44, 0.0  ;;  %1155 = vtanh.f32 %v299_v6 }
 0x104   :  { %v308_v46 = vpop.f32.mrb[15].mxu0  ;;  %v1496_v47 = vpop.f32.mrb[15].mxu1  ;;  %1157 = vtanh.f32 %v304_v7  ;;  %v314_v22 = vadd.f32 %v1066_v42, %v1430_v39  ;;  %v394_v30 = vadd.f32 %v1490_v43, %v1430_v39 }
 0x105   :  { %v1498_v48 = vpop.eup %1129  ;;  %1159 = vtanh.f32 %v379_v13  ;;  %v309_v21 = vadd.f32 %v1430_v39, %v308_v46  ;;  %v389_v29 = vadd.f32 %v1430_v39, %v1496_v47 }
 0x106   :  { %442 = vadd.xlane.f32.xlu0 %v441_v41  ;;  %v1504_v52 = vpop.eup %1131  ;;  %v492_v53 = vsel %vm63_vm0, %v1498_v48, 0.0  ;;  %1161 = vtanh.f32 %v384_v15 }
 0x107   :  { %445 = vadd.xlane.f32.xlu1 %v444_v45  ;;  %v1508_v54 = vpop.eup %1133  ;;  %v447_v57 = vsel %vm63_vm0, %v1504_v52, 0.0  ;;  %1163 = vtanh.f32 %v309_v21 }
 0x108   :  { %v1514_v58 = vpop.eup %1135  ;;  %v450_v59 = vsel %vm63_vm0, %v1508_v54, 0.0  ;;  %1165 = vtanh.f32 %v314_v22 }
 0x109   :  { %v1518_v60 = vpop.eup %1137  ;;  %v495_v63 = vsel %vm63_vm0, %v1514_v58, 0.0  ;;  %1167 = vtanh.f32 %v389_v29 }
 0x10a   :  { %490 = vadd.xlane.f32.xlu0 %v489_v51  ;;  %v1524_v1 = vpop.eup %1139  ;;  %v498_v2 = vsel %vm63_vm0, %v1518_v60, 0.0  ;;  %1169 = vtanh.f32 %v394_v30 }
 0x10b   :  { %493 = vadd.xlane.f32.xlu1 %v492_v53  ;;  %v1528_v4 = vpop.eup %1141  ;;  %v453_v8 = vsel %vm63_vm0, %v1524_v1, 0.0 }
 0x10c   :  { %v1534_v9 = vpop.eup %1143  ;;  %v456_v10 = vsel %vm63_vm0, %v1528_v4, 0.0 }
 0x10d   :  { %v1538_v12 = vpop.eup %1145  ;;  %v501_v16 = vsel %vm63_vm0, %v1534_v9, 0.0 }
 0x10e   :  { %448 = vadd.xlane.f32.xlu0 %v447_v57  ;;  %v1545_v18 = vpop.eup %1147  ;;  %v504_v19 = vsel %vm63_vm0, %v1538_v12, 0.0 }
 0x10f   :  { %451 = vadd.xlane.f32.xlu1 %v450_v59  ;;  %v1549_v20 = vpop.eup %1149  ;;  %v459_v23 = vsel %vm63_vm0, %v1545_v18, 0.0 }
 0x110   :  { %v1555_v24 = vpop.eup %1151  ;;  %v462_v25 = vsel %vm63_vm0, %v1549_v20, 0.0 }
 0x111   :  { %v1559_v27 = vpop.eup %1153  ;;  %v507_v31 = vsel %vm63_vm0, %v1555_v24, 0.0 }
 0x112   :  { %496 = vadd.xlane.f32.xlu0 %v495_v63  ;;  %v1567_v33 = vpop.eup %1155  ;;  %v510_v34 = vsel %vm63_vm0, %v1559_v27, 0.0 }
 0x113   :  { %499 = vadd.xlane.f32.xlu1 %v498_v2  ;;  %v1571_v36 = vpop.eup %1157  ;;  %v465_v37 = vsel %vm63_vm0, %v1567_v33, 0.0 }
 0x114   :  { %v1575_v38 = vpop.eup %1159  ;;  %v468_v39 = vsel %vm63_vm0, %v1571_v36, 0.0 }
 0x115   :  { %v1579_v40 = vpop.eup %1161  ;;  %v513_v41 = vsel %vm63_vm0, %v1575_v38, 0.0 }
 0x116   :  { %454 = vadd.xlane.f32.xlu0 %v453_v8  ;;  %v1583_v42 = vpop.eup %1163  ;;  %v516_v43 = vsel %vm63_vm0, %v1579_v40, 0.0 }
 0x117   :  { %457 = vadd.xlane.f32.xlu1 %v456_v10  ;;  %v1587_v45 = vpop.eup %1165  ;;  %v471_v46 = vsel %vm63_vm0, %v1583_v42, 0.0 }
 0x118   :  { %v1591_v47 = vpop.eup %1167  ;;  %v474_v49 = vsel %vm63_vm0, %v1587_v45, 0.0 }
 0x119   :  { %v1595_v50 = vpop.eup %1169  ;;  %v519_v51 = vsel %vm63_vm0, %v1591_v47, 0.0 }
 0x11a   :  { %502 = vadd.xlane.f32.xlu0 %v501_v16  ;;  %v522_v53 = vsel %vm63_vm0, %v1595_v50, 0.0 }
 0x11b   :  { %505 = vadd.xlane.f32.xlu1 %v504_v19 }
 0x11e   :  { %460 = vadd.xlane.f32.xlu0 %v459_v23 }
 0x11f   :  { %463 = vadd.xlane.f32.xlu1 %v462_v25 }
 0x122   :  { %508 = vadd.xlane.f32.xlu0 %v507_v31 }
 0x123   :  { %511 = vadd.xlane.f32.xlu1 %v510_v34 }
 0x126   :  { %466 = vadd.xlane.f32.xlu0 %v465_v37 }
 0x127   :  { %469 = vadd.xlane.f32.xlu1 %v468_v39 }
 0x12a   :  { %514 = vadd.xlane.f32.xlu0 %v513_v41 }
 0x12b   :  { %517 = vadd.xlane.f32.xlu1 %v516_v43 }
 0x12e   :  { %472 = vadd.xlane.f32.xlu0 %v471_v46 }
 0x12f   :  { %475 = vadd.xlane.f32.xlu1 %v474_v49 }
 0x132   :  { %520 = vadd.xlane.f32.xlu0 %v519_v51 }
 0x133   :  { %523 = vadd.xlane.f32.xlu1 %v522_v53 }
 0x183   :  { %v434_v55 = vpop.xlane.xlu0 %433 }
 0x184   :  { %v482_v56 = vpop.xlane.xlu1 %481  ;;  %v527_v57 = vmul.f32 0.03125, %v434_v55 }
 0x185   :  { %v543_v59 = vmul.f32 0.03125, %v482_v56 }
 0x186   :  { %v1602_v61 = vsub.f32 %v1442_v0, %v527_v57 }
 0x187   :  { %v1605_v62 = vsub.f32 %v1444_v3, %v543_v59  ;;  %v431_v63 = vpop.xlane.xlu0 %430 }
 0x188   :  { %v440_v2 = vpop.xlane.xlu1 %439  ;;  %v526_v6 = vmul.f32 0.03125, %v431_v63  ;;  %v591_v7 = vmul.f32 %v1602_v61, %v1602_v61 }
 0x189   :  { %v529_v8 = vmul.f32 0.03125, %v440_v2  ;;  %v607_v15 = vmul.f32 %v1605_v62, %v1605_v62 }
 0x18a   :  { %v1610_v10 = vsub.f32 %v1448_v5, %v526_v6  ;;  %v625_v13 = vsel %vm63_vm0, %v591_v7, 0.0 }
 0x18b   :  { %v1616_v0 = vsub.f32 %v1454_v11, %v529_v8  ;;  %626 = vadd.xlane.f32.xlu1 %v625_v13  ;;  %v479_v3 = vpop.xlane.xlu0 %478  ;;  %v673_v5 = vsel %vm63_vm0, %v607_v15, 0.0 }
 0x18c   :  { %v488_v16 = vpop.xlane.xlu1 %487  ;;  %v542_v19 = vmul.f32 0.03125, %v479_v3  ;;  %v590_v21 = vmul.f32 %v1610_v10, %v1610_v10 }
 0x18d   :  { %v545_v22 = vmul.f32 0.03125, %v488_v16  ;;  %v593_v29 = vmul.f32 %v1616_v0, %v1616_v0 }
 0x18e   :  { %v1621_v23 = vsub.f32 %v1456_v14, %v542_v19  ;;  %v622_v25 = vsel %vm63_vm0, %v590_v21, 0.0 }
 0x18f   :  { %v1628_v11 = vsub.f32 %v1462_v17, %v545_v22  ;;  %674 = vadd.xlane.f32.xlu1 %v673_v5  ;;  %623 = vadd.xlane.f32.xlu0 %v622_v25  ;;  %v485_v30 = vpop.xlane.xlu0 %484  ;;  %v631_v39 = vsel %vm63_vm0, %v593_v29, 0.0 }
 0x190   :  { %v437_v31 = vpop.xlane.xlu1 %436  ;;  %v544_v34 = vmul.f32 0.03125, %v485_v30  ;;  %v606_v37 = vmul.f32 %v1621_v23, %v1621_v23 }
 0x191   :  { %v528_v14 = vmul.f32 0.03125, %v437_v31  ;;  %v609_v43 = vmul.f32 %v1628_v11, %v1628_v11 }
 0x192   :  { %v670_v41 = vsel %vm63_vm0, %v606_v37, 0.0  ;;  %v1640_v17 = vsub.f32 %v1470_v26, %v544_v34 }
 0x193   :  { %v1637_v46 = vsub.f32 %v1473_v28, %v528_v14  ;;  %632 = vadd.xlane.f32.xlu1 %v631_v39  ;;  %671 = vadd.xlane.f32.xlu0 %v670_v41  ;;  %v443_v49 = vpop.xlane.xlu0 %442  ;;  %v679_v59 = vsel %vm63_vm0, %v609_v43, 0.0 }
 0x194   :  { %v446_v51 = vpop.xlane.xlu1 %445  ;;  %v530_v53 = vmul.f32 0.03125, %v443_v49  ;;  %v608_v2 = vmul.f32 %v1640_v17, %v1640_v17 }
 0x195   :  { %v531_v55 = vmul.f32 0.03125, %v446_v51  ;;  %v592_v56 = vmul.f32 %v1637_v46, %v1637_v46 }
 0x196   :  { %v1645_v57 = vsub.f32 %v1478_v32, %v530_v53  ;;  %v676_v16 = vsel %vm63_vm0, %v608_v2, 0.0 }
 0x197   :  { %v1649_v28 = vsub.f32 %v1480_v35, %v531_v55  ;;  %680 = vadd.xlane.f32.xlu1 %v679_v59  ;;  %v628_v26 = vsel %vm63_vm0, %v592_v56, 0.0  ;;  %v491_v63 = vpop.xlane.xlu0 %490 }
 0x198   :  { %v494_v6 = vpop.xlane.xlu1 %493  ;;  %629 = vadd.xlane.f32.xlu0 %v628_v26  ;;  %v546_v7 = vmul.f32 0.03125, %v491_v63  ;;  %v594_v13 = vmul.f32 %v1645_v57, %v1645_v57 }
 0x199   :  { %v547_v8 = vmul.f32 0.03125, %v494_v6  ;;  %v595_v32 = vmul.f32 %v1649_v28, %v1649_v28 }
 0x19a   :  { %v1662_v15 = vsub.f32 %v1492_v44, %v546_v7  ;;  %v634_v29 = vsel %vm63_vm0, %v594_v13, 0.0 }
 0x19b   :  { %v1659_v35 = vsub.f32 %v1498_v48, %v547_v8  ;;  %v637_v3 = vsel %vm63_vm0, %v595_v32, 0.0  ;;  %v449_v19 = vpop.xlane.xlu0 %448 }
 0x19c   :  { %638 = vadd.xlane.f32.xlu1 %v637_v3  ;;  %v452_v21 = vpop.xlane.xlu1 %451  ;;  %677 = vadd.xlane.f32.xlu0 %v676_v16  ;;  %v532_v22 = vmul.f32 0.03125, %v449_v19  ;;  %v610_v34 = vmul.f32 %v1662_v15, %v1662_v15 }
 0x19d   :  { %v533_v5 = vmul.f32 0.03125, %v452_v21  ;;  %v611_v25 = vmul.f32 %v1659_v35, %v1659_v35 }
 0x19e   :  { %v1673_v44 = vsub.f32 %v1504_v52, %v532_v22  ;;  %v682_v49 = vsel %vm63_vm0, %v610_v34, 0.0 }
 0x19f   :  { %v1670_v48 = vsub.f32 %v1508_v54, %v533_v5  ;;  %v685_v30 = vsel %vm63_vm0, %v611_v25, 0.0  ;;  %v497_v31 = vpop.xlane.xlu0 %496 }
 0x1a0   :  { %686 = vadd.xlane.f32.xlu1 %v685_v30  ;;  %v500_v37 = vpop.xlane.xlu1 %499  ;;  %635 = vadd.xlane.f32.xlu0 %v634_v29  ;;  %v548_v14 = vmul.f32 0.03125, %v497_v31  ;;  %v596_v53 = vmul.f32 %v1673_v44, %v1673_v44 }
 0x1a1   :  { %v549_v39 = vmul.f32 0.03125, %v500_v37  ;;  %v597_v41 = vmul.f32 %v1670_v48, %v1670_v48 }
 0x1a2   :  { %v1681_v54 = vsub.f32 %v1514_v58, %v548_v14  ;;  %v640_v6 = vsel %vm63_vm0, %v596_v53, 0.0 }
 0x1a3   :  { %v1684_v52 = vsub.f32 %v1518_v60, %v549_v39  ;;  %v643_v43 = vsel %vm63_vm0, %v597_v41, 0.0  ;;  %v455_v51 = vpop.xlane.xlu0 %454 }
 0x1a4   :  { %644 = vadd.xlane.f32.xlu1 %v643_v43  ;;  %v458_v55 = vpop.xlane.xlu1 %457  ;;  %683 = vadd.xlane.f32.xlu0 %v682_v49  ;;  %v534_v56 = vmul.f32 0.03125, %v455_v51  ;;  %v612_v60 = vmul.f32 %v1681_v54, %v1681_v54 }
 0x1a5   :  { %v535_v59 = vmul.f32 0.03125, %v458_v55  ;;  %v613_v58 = vmul.f32 %v1684_v52, %v1684_v52 }
 0x1a6   :  { %v1698_v63 = vsub.f32 %v1524_v1, %v534_v56  ;;  %v688_v16 = vsel %vm63_vm0, %v612_v60, 0.0 }
 0x1a7   :  { %v1695_v26 = vsub.f32 %v1528_v4, %v535_v59  ;;  %v691_v2 = vsel %vm63_vm0, %v613_v58, 0.0  ;;  %v503_v7 = vpop.xlane.xlu0 %502 }
 0x1a8   :  { %692 = vadd.xlane.f32.xlu1 %v691_v2  ;;  %v506_v8 = vpop.xlane.xlu1 %505  ;;  %641 = vadd.xlane.f32.xlu0 %v640_v6  ;;  %v550_v32 = vmul.f32 0.03125, %v503_v7  ;;  %v598_v22 = vmul.f32 %v1698_v63, %v1698_v63 }
 0x1a9   :  { %v551_v13 = vmul.f32 0.03125, %v506_v8  ;;  %v599_v3 = vmul.f32 %v1695_v26, %v1695_v26 }
 0x1aa   :  { %v1709_v1 = vsub.f32 %v1534_v9, %v550_v32  ;;  %v646_v34 = vsel %vm63_vm0, %v598_v22, 0.0 }
 0x1ab   :  { %v1706_v4 = vsub.f32 %v1538_v12, %v551_v13  ;;  %v649_v19 = vsel %vm63_vm0, %v599_v3, 0.0  ;;  %v461_v21 = vpop.xlane.xlu0 %460 }
 0x1ac   :  { %650 = vadd.xlane.f32.xlu1 %v649_v19  ;;  %v464_v5 = vpop.xlane.xlu1 %463  ;;  %689 = vadd.xlane.f32.xlu0 %v688_v16  ;;  %v536_v25 = vmul.f32 0.03125, %v461_v21  ;;  %v614_v14 = vmul.f32 %v1709_v1, %v1709_v1 }
 0x1ad   :  { %v537_v29 = vmul.f32 0.03125, %v464_v5  ;;  %v615_v30 = vmul.f32 %v1706_v4, %v1706_v4 }
 0x1ae   :  { %v1717_v12 = vsub.f32 %v1545_v18, %v536_v25  ;;  %v694_v55 = vsel %vm63_vm0, %v614_v14, 0.0 }
 0x1af   :  { %v1720_v9 = vsub.f32 %v1549_v20, %v537_v29  ;;  %v697_v31 = vsel %vm63_vm0, %v615_v30, 0.0  ;;  %v509_v37 = vpop.xlane.xlu0 %508 }
 0x1b0   :  { %698 = vadd.xlane.f32.xlu1 %v697_v31  ;;  %v512_v39 = vpop.xlane.xlu1 %511  ;;  %647 = vadd.xlane.f32.xlu0 %v646_v34  ;;  %v552_v41 = vmul.f32 0.03125, %v509_v37  ;;  %v600_v20 = vmul.f32 %v1717_v12, %v1717_v12 }
 0x1b1   :  { %v553_v43 = vmul.f32 0.03125, %v512_v39  ;;  %v601_v18 = vmul.f32 %v1720_v9, %v1720_v9 }
 0x1b2   :  { %v1734_v51 = vsub.f32 %v1555_v24, %v552_v41  ;;  %v652_v6 = vsel %vm63_vm0, %v600_v20, 0.0 }
 0x1b3   :  { %v1731_v49 = vsub.f32 %v1559_v27, %v553_v43  ;;  %v655_v53 = vsel %vm63_vm0, %v601_v18, 0.0  ;;  %v467_v56 = vpop.xlane.xlu0 %466 }
 0x1b4   :  { %656 = vadd.xlane.f32.xlu1 %v655_v53  ;;  %v470_v59 = vpop.xlane.xlu1 %469  ;;  %695 = vadd.xlane.f32.xlu0 %v694_v55  ;;  %v538_v58 = vmul.f32 0.03125, %v467_v56  ;;  %v616_v32 = vmul.f32 %v1734_v51, %v1734_v51 }
 0x1b5   :  { %v539_v60 = vmul.f32 0.03125, %v470_v59  ;;  %v617_v2 = vmul.f32 %v1731_v49, %v1731_v49 }
 0x1b6   :  { %v1745_v24 = vsub.f32 %v1567_v33, %v538_v58  ;;  %v700_v22 = vsel %vm63_vm0, %v616_v32, 0.0 }
 0x1b7   :  { %v1742_v27 = vsub.f32 %v1571_v36, %v539_v60  ;;  %v703_v7 = vsel %vm63_vm0, %v617_v2, 0.0  ;;  %v515_v8 = vpop.xlane.xlu0 %514 }
 0x1b8   :  { %704 = vadd.xlane.f32.xlu1 %v703_v7  ;;  %v518_v13 = vpop.xlane.xlu1 %517  ;;  %653 = vadd.xlane.f32.xlu0 %v652_v6  ;;  %v554_v3 = vmul.f32 0.03125, %v515_v8  ;;  %v602_v25 = vmul.f32 %v1745_v24, %v1745_v24 }
 0x1b9   :  { %v555_v16 = vmul.f32 0.03125, %v518_v13  ;;  %v603_v19 = vmul.f32 %v1742_v27, %v1742_v27 }
 0x1ba   :  { %v1753_v36 = vsub.f32 %v1575_v38, %v554_v3  ;;  %v658_v39 = vsel %vm63_vm0, %v602_v25, 0.0 }
 0x1bb   :  { %v1756_v33 = vsub.f32 %v1579_v40, %v555_v16  ;;  %v661_v21 = vsel %vm63_vm0, %v603_v19, 0.0  ;;  %v473_v5 = vpop.xlane.xlu0 %472 }
 0x1bc   :  { %662 = vadd.xlane.f32.xlu1 %v661_v21  ;;  %v476_v29 = vpop.xlane.xlu1 %475  ;;  %701 = vadd.xlane.f32.xlu0 %v700_v22  ;;  %v540_v30 = vmul.f32 0.03125, %v473_v5  ;;  %v618_v40 = vmul.f32 %v1753_v36, %v1753_v36 }
 0x1bd   :  { %v541_v31 = vmul.f32 0.03125, %v476_v29  ;;  %v619_v38 = vmul.f32 %v1756_v33, %v1756_v33 }
 0x1be   :  { %v1770_v37 = vsub.f32 %v1583_v42, %v540_v30  ;;  %v706_v55 = vsel %vm63_vm0, %v618_v40, 0.0 }
 0x1bf   :  { %v1767_v34 = vsub.f32 %v1587_v45, %v541_v31  ;;  %v709_v14 = vsel %vm63_vm0, %v619_v38, 0.0  ;;  %v521_v41 = vpop.xlane.xlu0 %520 }
 0x1c0   :  { %710 = vadd.xlane.f32.xlu1 %v709_v14  ;;  %v524_v43 = vpop.xlane.xlu1 %523  ;;  %659 = vadd.xlane.f32.xlu0 %v658_v39  ;;  %v556_v18 = vmul.f32 0.03125, %v521_v41  ;;  %v604_v59 = vmul.f32 %v1770_v37, %v1770_v37 }
 0x1c1   :  { %v557_v20 = vmul.f32 0.03125, %v524_v43  ;;  %v605_v53 = vmul.f32 %v1767_v34, %v1767_v34  ;;  %v1796_v43 = vld [vmem:[%s2030_s3] ss:$0 sm:$0xff] }
 0x1c2   :  { %v1781_v42 = vsub.f32 %v1591_v47, %v556_v18  ;;  %v664_v2 = vsel %vm63_vm0, %v604_v59, 0.0 }
 0x1c3   :  { %v1778_v45 = vsub.f32 %v1595_v50, %v557_v20  ;;  %v667_v56 = vsel %vm63_vm0, %v605_v53, 0.0 }
 0x1c4   :  { %668 = vadd.xlane.f32.xlu1 %v667_v56  ;;  %707 = vadd.xlane.f32.xlu0 %v706_v55  ;;  %v620_v50 = vmul.f32 %v1781_v42, %v1781_v42  ;;  %v1802_v55 = vld [vmem:[%s2031_s4] ss:$0 sm:$0xff] }
 0x1c5   :  { %v621_v58 = vmul.f32 %v1778_v45, %v1778_v45 }
 0x1c6   :  { %v712_v47 = vsel %vm63_vm0, %v620_v50, 0.0 }
 0x1c7   :  { %v715_v60 = vsel %vm63_vm0, %v621_v58, 0.0 }
 0x1c8   :  { %716 = vadd.xlane.f32.xlu1 %v715_v60  ;;  %665 = vadd.xlane.f32.xlu0 %v664_v2 }
 0x1cc   :  { %713 = vadd.xlane.f32.xlu0 %v712_v47 }
 0x218   :  { %v627_v6 = vpop.xlane.xlu1 %626 }
 0x219   :  { %v719_v7 = vmul.f32 0.03125, %v627_v6 }
 0x21b   :  { %v751_v8 = vadd.f32 1e-05, %v719_v7 }
 0x21c   :  { %v675_v32 = vpop.xlane.xlu1 %674  ;;  %v624_v13 = vpop.xlane.xlu0 %623 }
 0x21d   :  { %1171 = vrsqrt.f32 %v751_v8  ;;  %v735_v3 = vmul.f32 0.03125, %v675_v32  ;;  %v718_v16 = vmul.f32 0.03125, %v624_v13 }
 0x21f   :  { %v767_v19 = vadd.f32 1e-05, %v735_v3  ;;  %v750_v21 = vadd.f32 1e-05, %v718_v16 }
 0x220   :  { %v633_v22 = vpop.xlane.xlu1 %632  ;;  %v672_v5 = vpop.xlane.xlu0 %671 }
 0x221   :  { %1173 = vrsqrt.f32 %v767_v19  ;;  %v721_v25 = vmul.f32 0.03125, %v633_v22  ;;  %v734_v29 = vmul.f32 0.03125, %v672_v5 }
 0x222   :  { %1175 = vrsqrt.f32 %v750_v21 }
 0x223   :  { %v753_v30 = vadd.f32 1e-05, %v721_v25  ;;  %v766_v31 = vadd.f32 1e-05, %v734_v29 }
 0x224   :  { %v681_v38 = vpop.xlane.xlu1 %680 }
 0x225   :  { %1177 = vrsqrt.f32 %v753_v30  ;;  %v737_v40 = vmul.f32 0.03125, %v681_v38  ;;  %v630_v14 = vpop.xlane.xlu0 %629 }
 0x226   :  { %1179 = vrsqrt.f32 %v766_v31  ;;  %v720_v39 = vmul.f32 0.03125, %v630_v14 }
 0x227   :  { %v1172_v41 = vpop.eup %1171  ;;  %v769_v18 = vadd.f32 1e-05, %v737_v40 }
 0x228   :  { %v815_v20 = vmul.f32 %v1172_v41, %v1602_v61  ;;  %v752_v53 = vadd.f32 1e-05, %v720_v39 }
 0x229   :  { %1181 = vrsqrt.f32 %v769_v18  ;;  %v639_v56 = vpop.xlane.xlu1 %638  ;;  %v678_v59 = vpop.xlane.xlu0 %677 }
 0x22a   :  { %v854_v58 = vmul.f32 %v1796_v43, %v815_v20  ;;  %1183 = vrsqrt.f32 %v752_v53  ;;  %v723_v60 = vmul.f32 0.03125, %v639_v56  ;;  %v736_v2 = vmul.f32 0.03125, %v678_v59 }
 0x22b   :  { %v1174_v50 = vpop.eup %1173 }
 0x22c   :  { %v1176_v47 = vpop.eup %1175  ;;  %v893_v6 = vadd.f32 %v1802_v55, %v854_v58  ;;  %v831_v61 = vmul.f32 %v1174_v50, %v1605_v62  ;;  %v755_v7 = vadd.f32 1e-05, %v723_v60  ;;  %v768_v8 = vadd.f32 1e-05, %v736_v2 }
 0x22d   :  { %v814_v32 = vmul.f32 %v1176_v47, %v1610_v10  ;;  %v687_v13 = vpop.xlane.xlu1 %686  ;;  %v636_v3 = vpop.xlane.xlu0 %635 }
 0x22e   :  { %925 = vst.msk [vmem:[%s2032_s5 + $0x8] sm:$0xff] %vm63_vm0, %v893_v6  ;;  %v870_v16 = vmul.f32 %v1796_v43, %v831_v61  ;;  %1185 = vrsqrt.f32 %v755_v7  ;;  %v739_v19 = vmul.f32 0.03125, %v687_v13  ;;  %v722_v21 = vmul.f32 0.03125, %v636_v3 }
 0x22f   :  { %v1178_v22 = vpop.eup %1177  ;;  %v853_v5 = vmul.f32 %v1796_v43, %v814_v32  ;;  %1187 = vrsqrt.f32 %v768_v8 }
 0x230   :  { %v1180_v62 = vpop.eup %1179  ;;  %v909_v25 = vadd.f32 %v1802_v55, %v870_v16  ;;  %v817_v10 = vmul.f32 %v1178_v22, %v1616_v0  ;;  %v771_v29 = vadd.f32 1e-05, %v739_v19  ;;  %v754_v30 = vadd.f32 1e-05, %v722_v21 }
 0x231   :  { %v892_v31 = vadd.f32 %v1802_v55, %v853_v5  ;;  %v830_v38 = vmul.f32 %v1180_v62, %v1621_v23  ;;  %v645_v40 = vpop.xlane.xlu1 %644  ;;  %v684_v14 = vpop.xlane.xlu0 %683 }
 0x232   :  { %941 = vst.msk [vmem:[%s2032_s5 + $0x88] sm:$0xff] %vm63_vm0, %v909_v25  ;;  %v856_v39 = vmul.f32 %v1796_v43, %v817_v10  ;;  %1189 = vrsqrt.f32 %v771_v29  ;;  %v725_v41 = vmul.f32 0.03125, %v645_v40  ;;  %v738_v18 = vmul.f32 0.03125, %v684_v14 }
 0x233   :  { %v1182_v20 = vpop.eup %1181  ;;  %924 = vst.msk [vmem:[%s2032_s5] sm:$0xff] %vm63_vm0, %v892_v31  ;;  %v869_v0 = vmul.f32 %v1796_v43, %v830_v38  ;;  %1191 = vrsqrt.f32 %v754_v30 }
 0x234   :  { %v1184_v23 = vpop.eup %1183  ;;  %v895_v53 = vadd.f32 %v1802_v55, %v856_v39  ;;  %v833_v56 = vmul.f32 %v1182_v20, %v1628_v11  ;;  %v757_v59 = vadd.f32 1e-05, %v725_v41  ;;  %v770_v58 = vadd.f32 1e-05, %v738_v18 }
 0x235   :  { %v908_v60 = vadd.f32 %v1802_v55, %v869_v0  ;;  %v816_v2 = vmul.f32 %v1184_v23, %v1637_v46  ;;  %v693_v50 = vpop.xlane.xlu1 %692  ;;  %v642_v47 = vpop.xlane.xlu0 %641 }
 0x236   :  { %927 = vst.msk [vmem:[%s2032_s5 + $0x18] sm:$0xff] %vm63_vm0, %v895_v53  ;;  %v872_v6 = vmul.f32 %v1796_v43, %v833_v56  ;;  %1193 = vrsqrt.f32 %v757_v59  ;;  %v741_v61 = vmul.f32 0.03125, %v693_v50  ;;  %v724_v7 = vmul.f32 0.03125, %v642_v47 }
 0x237   :  { %940 = vst.msk [vmem:[%s2032_s5 + $0x80] sm:$0xff] %vm63_vm0, %v908_v60  ;;  %v855_v11 = vmul.f32 %v1796_v43, %v816_v2  ;;  %1195 = vrsqrt.f32 %v770_v58 }
 0x238   :  { %v1186_v46 = vpop.eup %1185  ;;  %v911_v8 = vadd.f32 %v1802_v55, %v872_v6  ;;  %v773_v32 = vadd.f32 1e-05, %v741_v61  ;;  %v756_v13 = vadd.f32 1e-05, %v724_v7 }
 0x239   :  { %v1188_v3 = vpop.eup %1187  ;;  %v894_v16 = vadd.f32 %v1802_v55, %v855_v11  ;;  %v819_v19 = vmul.f32 %v1186_v46, %v1649_v28  ;;  %v651_v21 = vpop.xlane.xlu1 %650 }
 0x23a   :  { %v690_v22 = vpop.xlane.xlu0 %689  ;;  %943 = vst.msk [vmem:[%s2032_s5 + $0x98] sm:$0xff] %vm63_vm0, %v911_v8  ;;  %v832_v5 = vmul.f32 %v1188_v3, %v1640_v17  ;;  %1197 = vrsqrt.f32 %v773_v32  ;;  %v727_v62 = vmul.f32 0.03125, %v651_v21 }
 0x23b   :  { %v740_v25 = vmul.f32 0.03125, %v690_v22  ;;  %926 = vst.msk [vmem:[%s2032_s5 + $0x10] sm:$0xff] %vm63_vm0, %v894_v16  ;;  %v858_v10 = vmul.f32 %v1796_v43, %v819_v19  ;;  %1199 = vrsqrt.f32 %v756_v13 }
 0x23c   :  { %v1190_v28 = vpop.eup %1189  ;;  %v871_v29 = vmul.f32 %v1796_v43, %v832_v5  ;;  %v759_v30 = vadd.f32 1e-05, %v727_v62 }
 0x23d   :  { %v772_v31 = vadd.f32 1e-05, %v740_v25  ;;  %v1192_v38 = vpop.eup %1191  ;;  %v897_v40 = vadd.f32 %v1802_v55, %v858_v10  ;;  %v835_v17 = vmul.f32 %v1190_v28, %v1659_v35  ;;  %v699_v14 = vpop.xlane.xlu1 %698 }
 0x23e   :  { %v648_v39 = vpop.xlane.xlu0 %647  ;;  %v910_v41 = vadd.f32 %v1802_v55, %v871_v29  ;;  %v818_v18 = vmul.f32 %v1192_v38, %v1645_v57  ;;  %1201 = vrsqrt.f32 %v759_v30  ;;  %v743_v20 = vmul.f32 0.03125, %v699_v14 }
 0x23f   :  { %929 = vst.msk [vmem:[%s2032_s5 + $0x28] sm:$0xff] %vm63_vm0, %v897_v40  ;;  %v874_v0 = vmul.f32 %v1796_v43, %v835_v17  ;;  %1203 = vrsqrt.f32 %v772_v31  ;;  %v726_v23 = vmul.f32 0.03125, %v648_v39 }
 0x240   :  { %v1194_v53 = vpop.eup %1193  ;;  %942 = vst.msk [vmem:[%s2032_s5 + $0x90] sm:$0xff] %vm63_vm0, %v910_v41  ;;  %v857_v35 = vmul.f32 %v1796_v43, %v818_v18  ;;  %v775_v57 = vadd.f32 1e-05, %v743_v20 }
 0x241   :  { %v1196_v56 = vpop.eup %1195  ;;  %v913_v59 = vadd.f32 %v1802_v55, %v874_v0  ;;  %v821_v58 = vmul.f32 %v1194_v53, %v1670_v48  ;;  %v758_v60 = vadd.f32 1e-05, %v726_v23  ;;  %v657_v2 = vpop.xlane.xlu1 %656 }
 0x242   :  { %v696_v50 = vpop.xlane.xlu0 %695  ;;  %v896_v47 = vadd.f32 %v1802_v55, %v857_v35  ;;  %v834_v6 = vmul.f32 %v1196_v56, %v1662_v15  ;;  %1205 = vrsqrt.f32 %v775_v57  ;;  %v729_v61 = vmul.f32 0.03125, %v657_v2 }
 0x243   :  { %945 = vst.msk [vmem:[%s2032_s5 + $0xa8] sm:$0xff] %vm63_vm0, %v913_v59  ;;  %v860_v7 = vmul.f32 %v1796_v43, %v821_v58  ;;  %1207 = vrsqrt.f32 %v758_v60  ;;  %v742_v11 = vmul.f32 0.03125, %v696_v50 }
 0x244   :  { %v1198_v46 = vpop.eup %1197  ;;  %928 = vst.msk [vmem:[%s2032_s5 + $0x20] sm:$0xff] %vm63_vm0, %v896_v47  ;;  %v873_v48 = vmul.f32 %v1796_v43, %v834_v6  ;;  %v761_v15 = vadd.f32 1e-05, %v729_v61 }
 0x245   :  { %v1200_v8 = vpop.eup %1199  ;;  %v899_v32 = vadd.f32 %v1802_v55, %v860_v7  ;;  %v837_v13 = vmul.f32 %v1198_v46, %v1684_v52  ;;  %v774_v3 = vadd.f32 1e-05, %v742_v11  ;;  %v705_v16 = vpop.xlane.xlu1 %704 }
 0x246   :  { %v654_v19 = vpop.xlane.xlu0 %653  ;;  %v912_v21 = vadd.f32 %v1802_v55, %v873_v48  ;;  %v820_v22 = vmul.f32 %v1200_v8, %v1673_v44  ;;  %1209 = vrsqrt.f32 %v761_v15  ;;  %v745_v5 = vmul.f32 0.03125, %v705_v16 }
 0x247   :  { %931 = vst.msk [vmem:[%s2032_s5 + $0x38] sm:$0xff] %vm63_vm0, %v899_v32  ;;  %v876_v62 = vmul.f32 %v1796_v43, %v837_v13  ;;  %1211 = vrsqrt.f32 %v774_v3  ;;  %v728_v25 = vmul.f32 0.03125, %v654_v19 }
 0x248   :  { %v1202_v10 = vpop.eup %1201  ;;  %944 = vst.msk [vmem:[%s2032_s5 + $0xa0] sm:$0xff] %vm63_vm0, %v912_v21  ;;  %v859_v52 = vmul.f32 %v1796_v43, %v820_v22  ;;  %v777_v44 = vadd.f32 1e-05, %v745_v5 }
 0x249   :  { %v1204_v28 = vpop.eup %1203  ;;  %v915_v29 = vadd.f32 %v1802_v55, %v876_v62  ;;  %v823_v30 = vmul.f32 %v1202_v10, %v1695_v26  ;;  %v760_v31 = vadd.f32 1e-05, %v728_v25  ;;  %v663_v38 = vpop.xlane.xlu1 %662 }
 0x24a   :  { %v702_v40 = vpop.xlane.xlu0 %701  ;;  %v898_v17 = vadd.f32 %v1802_v55, %v859_v52  ;;  %v836_v14 = vmul.f32 %v1204_v28, %v1681_v54  ;;  %1213 = vrsqrt.f32 %v777_v44  ;;  %v731_v39 = vmul.f32 0.03125, %v663_v38 }
 0x24b   :  { %947 = vst.msk [vmem:[%s2032_s5 + $0xb8] sm:$0xff] %vm63_vm0, %v915_v29  ;;  %v862_v41 = vmul.f32 %v1796_v43, %v823_v30  ;;  %1215 = vrsqrt.f32 %v760_v31  ;;  %v744_v18 = vmul.f32 0.03125, %v702_v40 }
 0x24c   :  { %v1206_v20 = vpop.eup %1205  ;;  %930 = vst.msk [vmem:[%s2032_s5 + $0x30] sm:$0xff] %vm63_vm0, %v898_v17  ;;  %v875_v26 = vmul.f32 %v1796_v43, %v836_v14  ;;  %v763_v54 = vadd.f32 1e-05, %v731_v39 }
 0x24d   :  { %v1208_v0 = vpop.eup %1207  ;;  %v901_v23 = vadd.f32 %v1802_v55, %v862_v41  ;;  %v839_v53 = vmul.f32 %v1206_v20, %v1706_v4  ;;  %v776_v35 = vadd.f32 1e-05, %v744_v18  ;;  %v711_v57 = vpop.xlane.xlu1 %710 }
 0x24e   :  { %v660_v56 = vpop.xlane.xlu0 %659  ;;  %v914_v59 = vadd.f32 %v1802_v55, %v875_v26  ;;  %v822_v58 = vmul.f32 %v1208_v0, %v1698_v63  ;;  %1217 = vrsqrt.f32 %v763_v54  ;;  %v747_v60 = vmul.f32 0.03125, %v711_v57 }
 0x24f   :  { %933 = vst.msk [vmem:[%s2032_s5 + $0x48] sm:$0xff] %vm63_vm0, %v901_v23  ;;  %v878_v2 = vmul.f32 %v1796_v43, %v839_v53  ;;  %1219 = vrsqrt.f32 %v776_v35  ;;  %v730_v50 = vmul.f32 0.03125, %v660_v56 }
 0x250   :  { %v1210_v47 = vpop.eup %1209  ;;  %946 = vst.msk [vmem:[%s2032_s5 + $0xb0] sm:$0xff] %vm63_vm0, %v914_v59  ;;  %v861_v4 = vmul.f32 %v1796_v43, %v822_v58  ;;  %v779_v63 = vadd.f32 1e-05, %v747_v60 }
 0x251   :  { %v1212_v6 = vpop.eup %1211  ;;  %v917_v61 = vadd.f32 %v1802_v55, %v878_v2  ;;  %v825_v7 = vmul.f32 %v1210_v47, %v1720_v9  ;;  %v762_v11 = vadd.f32 1e-05, %v730_v50  ;;  %v669_v46 = vpop.xlane.xlu1 %668 }
 0x252   :  { %v708_v48 = vpop.xlane.xlu0 %707  ;;  %v900_v15 = vadd.f32 %v1802_v55, %v861_v4  ;;  %v838_v8 = vmul.f32 %v1212_v6, %v1709_v1  ;;  %1221 = vrsqrt.f32 %v779_v63  ;;  %v733_v32 = vmul.f32 0.03125, %v669_v46 }
 0x253   :  { %949 = vst.msk [vmem:[%s2032_s5 + $0xc8] sm:$0xff] %vm63_vm0, %v917_v61  ;;  %v864_v13 = vmul.f32 %v1796_v43, %v825_v7  ;;  %1223 = vrsqrt.f32 %v762_v11  ;;  %v746_v3 = vmul.f32 0.03125, %v708_v48 }
 0x254   :  { %v1214_v16 = vpop.eup %1213  ;;  %932 = vst.msk [vmem:[%s2032_s5 + $0x40] sm:$0xff] %vm63_vm0, %v900_v15  ;;  %v877_v9 = vmul.f32 %v1796_v43, %v838_v8  ;;  %v765_v1 = vadd.f32 1e-05, %v733_v32 }
 0x255   :  { %v1216_v19 = vpop.eup %1215  ;;  %v903_v21 = vadd.f32 %v1802_v55, %v864_v13  ;;  %v841_v22 = vmul.f32 %v1214_v16, %v1731_v49  ;;  %v778_v5 = vadd.f32 1e-05, %v746_v3  ;;  %v717_v62 = vpop.xlane.xlu1 %716 }
 0x256   :  { %v666_v25 = vpop.xlane.xlu0 %665  ;;  %v916_v10 = vadd.f32 %v1802_v55, %v877_v9  ;;  %v824_v52 = vmul.f32 %v1216_v19, %v1717_v12  ;;  %1225 = vrsqrt.f32 %v765_v1  ;;  %v749_v44 = vmul.f32 0.03125, %v717_v62 }
 0x257   :  { %935 = vst.msk [vmem:[%s2032_s5 + $0x58] sm:$0xff] %vm63_vm0, %v903_v21  ;;  %v880_v28 = vmul.f32 %v1796_v43, %v841_v22  ;;  %1227 = vrsqrt.f32 %v778_v5  ;;  %v732_v29 = vmul.f32 0.03125, %v666_v25 }
 0x258   :  { %v1218_v30 = vpop.eup %1217  ;;  %948 = vst.msk [vmem:[%s2032_s5 + $0xc0] sm:$0xff] %vm63_vm0, %v916_v10  ;;  %v863_v49 = vmul.f32 %v1796_v43, %v824_v52  ;;  %v781_v12 = vadd.f32 1e-05, %v749_v44 }
 0x259   :  { %v1220_v31 = vpop.eup %1219  ;;  %v919_v38 = vadd.f32 %v1802_v55, %v880_v28  ;;  %v827_v40 = vmul.f32 %v1218_v30, %v1742_v27  ;;  %v764_v17 = vadd.f32 1e-05, %v732_v29 }
 0x25a   :  { %v714_v14 = vpop.xlane.xlu0 %713  ;;  %v902_v39 = vadd.f32 %v1802_v55, %v863_v49  ;;  %v840_v41 = vmul.f32 %v1220_v31, %v1734_v51  ;;  %1229 = vrsqrt.f32 %v781_v12 }
 0x25b   :  { %v748_v18 = vmul.f32 0.03125, %v714_v14  ;;  %951 = vst.msk [vmem:[%s2032_s5 + $0xd8] sm:$0xff] %vm63_vm0, %v919_v38  ;;  %v866_v20 = vmul.f32 %v1796_v43, %v827_v40  ;;  %1231 = vrsqrt.f32 %v764_v17 }
 0x25c   :  { %v1222_v26 = vpop.eup %1221  ;;  %934 = vst.msk [vmem:[%s2032_s5 + $0x50] sm:$0xff] %vm63_vm0, %v902_v39  ;;  %v879_v27 = vmul.f32 %v1796_v43, %v840_v41 }
 0x25d   :  { %v780_v54 = vadd.f32 1e-05, %v748_v18  ;;  %v1224_v51 = vpop.eup %1223  ;;  %v905_v0 = vadd.f32 %v1802_v55, %v866_v20  ;;  %v843_v23 = vmul.f32 %v1222_v26, %v1756_v33 }
 0x25e   :  { %v918_v53 = vadd.f32 %v1802_v55, %v879_v27  ;;  %v826_v35 = vmul.f32 %v1224_v51, %v1745_v24 }
 0x25f   :  { %1233 = vrsqrt.f32 %v780_v54  ;;  %937 = vst.msk [vmem:[%s2032_s5 + $0x68] sm:$0xff] %vm63_vm0, %v905_v0  ;;  %v882_v57 = vmul.f32 %v1796_v43, %v843_v23 }
 0x260   :  { %v1226_v56 = vpop.eup %1225  ;;  %950 = vst.msk [vmem:[%s2032_s5 + $0xd0] sm:$0xff] %vm63_vm0, %v918_v53  ;;  %v865_v33 = vmul.f32 %v1796_v43, %v826_v35 }
 0x261   :  { %v1228_v59 = vpop.eup %1227  ;;  %v921_v58 = vadd.f32 %v1802_v55, %v882_v57  ;;  %v829_v24 = vmul.f32 %v1226_v56, %v1767_v34 }
 0x262   :  { %v904_v60 = vadd.f32 %v1802_v55, %v865_v33  ;;  %v842_v2 = vmul.f32 %v1228_v59, %v1753_v36 }
 0x263   :  { %953 = vst.msk [vmem:[%s2032_s5 + $0xe8] sm:$0xff] %vm63_vm0, %v921_v58  ;;  %v868_v50 = vmul.f32 %v1796_v43, %v829_v24 }
 0x264   :  { %v1230_v47 = vpop.eup %1229  ;;  %936 = vst.msk [vmem:[%s2032_s5 + $0x60] sm:$0xff] %vm63_vm0, %v904_v60  ;;  %v881_v4 = vmul.f32 %v1796_v43, %v842_v2 }
 0x265   :  { %v1232_v34 = vpop.eup %1231  ;;  %v907_v63 = vadd.f32 %v1802_v55, %v868_v50  ;;  %v845_v36 = vmul.f32 %v1230_v47, %v1778_v45 }
 0x266   :  { %v920_v6 = vadd.f32 %v1802_v55, %v881_v4  ;;  %v828_v61 = vmul.f32 %v1232_v34, %v1770_v37 }
 0x267   :  { %939 = vst.msk [vmem:[%s2032_s5 + $0x78] sm:$0xff] %vm63_vm0, %v907_v63  ;;  %v884_v7 = vmul.f32 %v1796_v43, %v845_v36 }
 0x268   :  { %952 = vst.msk [vmem:[%s2032_s5 + $0xe0] sm:$0xff] %vm63_vm0, %v920_v6  ;;  %v867_v46 = vmul.f32 %v1796_v43, %v828_v61 }
 0x269   :  { %v1234_v11 = vpop.eup %1233  ;;  %v923_v45 = vadd.f32 %v1802_v55, %v884_v7 }
 0x26a   :  { %v844_v48 = vmul.f32 %v1234_v11, %v1781_v42  ;;  %v906_v37 = vadd.f32 %v1802_v55, %v867_v46 }
 0x26b   :  { %955 = vst.msk [vmem:[%s2032_s5 + $0xf8] sm:$0xff] %vm63_vm0, %v923_v45 }
 0x26c   :  { %v883_v15 = vmul.f32 %v1796_v43, %v844_v48  ;;  %938 = vst.msk [vmem:[%s2032_s5 + $0x70] sm:$0xff] %vm63_vm0, %v906_v37 }
 0x26e   :  { %v922_v8 = vadd.f32 %v1802_v55, %v883_v15 }
 0x270   :  { %954 = vst.msk [vmem:[%s2032_s5 + $0xf0] sm:$0xff] %vm63_vm0, %v922_v8 }

</bundles_post_ra>
